<compile_context>
chip_gen: v6e
topology: v6e:2x2x1
jax: 0.10.0
libtpu: 0.0.40
codegen_flags: <defaults>
</compile_context>

<pallas_src>
import functools

import jax
import jax.numpy as jnp
from jax.experimental import pallas as pl
from jax.experimental.pallas import tpu as pltpu


# ---------------------------------------------------------------------------
# Fused Pallas kernel:  out = W2' @ relu(W1' @ x + b1 + t_norm*w_t) + b2'
# (V / Vt already folded into W1', W2', b2' in the wrapper; HW on the lane axis.)
# ---------------------------------------------------------------------------
def _svdgm_kernel(t_ref, x_ref, w1_ref, b1c_ref, wt_ref, w2_ref, b2_ref, o_ref,
                  *, inv_num_t):
    # timestep conditioning from the SMEM scalar, on the VPU (hoisted out of the
    # batch loop; no per-call bias array materialized host-side)
    t_norm = t_ref[0].astype(jnp.float32) * inv_num_t
    bias1 = b1c_ref[...] + t_norm * wt_ref[...]                    # (HIDDEN, 1) f32

    nbatch = x_ref.shape[0]                                        # static
    for b in range(nbatch):                                        # unrolled over B
        xb = x_ref[b].astype(jnp.bfloat16)                         # (C, T_HW) cast in-kernel
        # denoiser layer 1 (folded with H.V) + timestep bias, ReLU
        h = jnp.dot(w1_ref[...], xb,
                    preferred_element_type=jnp.float32) + bias1    # (HIDDEN, T_HW) f32
        h = jnp.maximum(h, 0.0)
        # denoiser layer 2 (folded with H.Vt) + folded bias
        out = jnp.dot(w2_ref[...], h.astype(jnp.bfloat16),
                      preferred_element_type=jnp.float32) + b2_ref[...]   # (C, T_HW)
        o_ref[b] = out.astype(o_ref.dtype)


def _pick_hw_tile(hw, cap=2048):
    """Lane-tile for the HW axis: whole HW if small, else a multiple of 128 <= cap
    that divides HW (keeps v7x VMEM happy and gives >=2 grid steps for pipelining)."""
    if hw <= cap:
        return hw
    t = (cap // 128) * 128
    while t >= 128:
        if hw % t == 0:
            return t
        t -= 128
    return hw


@functools.partial(jax.jit, static_argnames=("num_timesteps",))
def _fused_svdgm_forward(x, t, w1p_b, b1c, w_t_col, w2p_b, b2p, *, num_timesteps):
    """x: [B, C, H, W] f32.  Computes H.Vt(net(H.V(x), t)) with folded weights."""
    B, C, H, W = x.shape
    HW = H * W
    HIDDEN = w1p_b.shape[0]
    T_HW = _pick_hw_tile(HW)

    # NCHW is already (B, C, HW)-contiguous: pure reshape, no transpose, NO dtype cast.
    x_b = x.reshape(B, C, HW)
    t_arr = jnp.asarray(t, jnp.int32).reshape(1)

    kernel = functools.partial(_svdgm_kernel, inv_num_t=1.0 / float(num_timesteps))

    out = pl.pallas_call(
        kernel,
        out_shape=jax.ShapeDtypeStruct((B, C, HW), jnp.float32),
        grid_spec=pltpu.PrefetchScalarGridSpec(
            num_scalar_prefetch=1,                 # t -> SMEM scalar
            grid=(HW // T_HW,),                    # 1 step at toy size; >=2 at scale
            in_specs=[
                pl.BlockSpec((B, C, T_HW), lambda i, t_s: (0, 0, i)),   # x (f32)
                pl.BlockSpec((HIDDEN, C), lambda i, t_s: (0, 0)),       # W1' (resident)
                pl.BlockSpec((HIDDEN, 1), lambda i, t_s: (0, 0)),       # b1 + b_t
                pl.BlockSpec((HIDDEN, 1), lambda i, t_s: (0, 0)),       # w_t
                pl.BlockSpec((C, HIDDEN), lambda i, t_s: (0, 0)),       # W2' (resident)
                pl.BlockSpec((C, 1), lambda i, t_s: (0, 0)),            # b2'
            ],
            out_specs=pl.BlockSpec((B, C, T_HW), lambda i, t_s: (0, 0, i)),
        ),
        compiler_params=pltpu.CompilerParams(
            dimension_semantics=("parallel",)),    # HW tiles independent; v7x megacore
    )(t_arr, x_b, w1p_b, b1c, w_t_col, w2p_b, b2p)
    return out.reshape(B, C, H, W)


# ---------------------------------------------------------------------------
# Synthetic injected components (deterministic, plain-f32 references).
# ---------------------------------------------------------------------------
class ChannelMLPDenoiser:
    """Tiny per-pixel channel MLP with linear timestep conditioning."""

    def __init__(self, key, channels, hidden, num_timesteps):
        kw1, kb1, kw2, kb2, kwt, kbt = jax.random.split(key, 6)
        self.num_timesteps = num_timesteps
        self.w1t = jax.random.normal(kw1, (hidden, channels), jnp.float32) * 0.2
        self.b1 = jax.random.normal(kb1, (hidden,), jnp.float32) * 0.05
        self.w2t = jax.random.normal(kw2, (channels, hidden), jnp.float32) * 0.2
        self.b2 = jax.random.normal(kb2, (channels,), jnp.float32) * 0.05
        self.w_t = jax.random.normal(kwt, (hidden,), jnp.float32) * 0.1
        self.b_t = jax.random.normal(kbt, (hidden,), jnp.float32) * 0.1

    def time_bias(self, t):
        t_norm = jnp.asarray(t, jnp.float32) / jnp.float32(self.num_timesteps)
        return self.b1 + t_norm * self.w_t + self.b_t          # (hidden,)

    def __call__(self, x, t):
        """Pure-JAX f32 reference (module semantics)."""
        B, C, H, W = x.shape
        xr = x.reshape(B, C, H * W)
        h = jnp.einsum('hc,bcp->bhp', self.w1t, xr)
        h = jnp.maximum(h + self.time_bias(t)[None, :, None], 0.0)
        eps = jnp.einsum('ch,bhp->bcp', self.w2t, h) + self.b2[None, :, None]
        return eps.reshape(B, C, H, W)


class ChannelOrthogonalHFunc:
    """Synthetic DDRM-style H_func whose V mixes channels per pixel (orthogonal CxC)."""

    def __init__(self, key, channels):
        a = jax.random.normal(key, (channels, channels), jnp.float32)
        q, _ = jnp.linalg.qr(a)
        self.v_c = q.astype(jnp.float32)

    def V(self, x):      # x: [B, C, H, W]
        return jnp.einsum('ij,bjhw->bihw', self.v_c, x)

    def Vt(self, x):
        return jnp.einsum('ji,bjhw->bihw', self.v_c, x)


# ---------------------------------------------------------------------------
# EpsilonNet / EpsilonNetSVDGM (JAX mirror of the PyTorch module).
# ---------------------------------------------------------------------------
class EpsilonNet:
    def __init__(self, net, alphas_cumprod, timesteps):
        self.net = net
        self.alphas_cumprod = alphas_cumprod
        self.acp_f8 = alphas_cumprod.astype(jnp.float64) \
            if jax.config.jax_enable_x64 else alphas_cumprod.astype(jnp.float32)
        self.timesteps = timesteps

    def forward(self, x, t):
        return self.net(x, jnp.asarray(t))

    __call__ = forward

    def predict_x0(self, x, t):
        acp_t = self.alphas_cumprod[t] / self.alphas_cumprod[
            self.timesteps[0].astype(jnp.int32)]
        return (x - (1 - acp_t) ** 0.5 * self.forward(x, t)) / acp_t ** 0.5

    def score(self, x, t):
        acp_t = self.alphas_cumprod[t] / self.alphas_cumprod[self.timesteps[0]]
        return -self.forward(x, t) / (1 - acp_t) ** 0.5

    def decode(self, z):
        return self.net.decode(z)                 # TODO(synk): synthetic net has no decoder

    def differentiable_decode(self, z):
        return self.net.differentiable_decode(z)  # TODO(synk): synthetic net has no decoder


class EpsilonNetSVDGM(EpsilonNet):
    def __init__(self, net, alphas_cumprod, timesteps, H_func):
        super().__init__(net, alphas_cumprod, timesteps)
        self.H_func = H_func
        # Algebraic fold of V / Vt into the per-pixel MLP (done ONCE, in f32):
        #   Vt(W2t @ relu(W1t @ (V@x) + b1(t)) + b2) == W2'@relu(W1'@x + b1(t)) + b2'
        V = H_func.v_c                       # (C, C)
        Vt = V.T
        w1p = net.w1t @ V                    # (HIDDEN, C)
        w2p = Vt @ net.w2t                   # (C, HIDDEN)
        self.w1p_b = w1p.astype(jnp.bfloat16)                               # MXU operand
        self.w2p_b = w2p.astype(jnp.bfloat16)                               # MXU operand
        self.b1c = (net.b1 + net.b_t).reshape(-1, 1).astype(jnp.float32)    # (HIDDEN, 1)
        self.w_t_col = net.w_t.reshape(-1, 1).astype(jnp.float32)           # (HIDDEN, 1)
        self.b2p = (Vt @ net.b2).reshape(-1, 1).astype(jnp.float32)         # (C, 1)

    def forward(self, x, t):
        # == H_func.Vt(net(H_func.V(x), t)), fused into one Pallas kernel.
        return _fused_svdgm_forward(
            x, t, self.w1p_b, self.b1c, self.w_t_col, self.w2p_b, self.b2p,
            num_timesteps=self.net.num_timesteps)

    __call__ = forward


# ---------------------------------------------------------------------------
# References for verification.
# ---------------------------------------------------------------------------
def _r_bf16(a):
    return a.astype(jnp.bfloat16).astype(jnp.float32)


def _reference_folded(model, x, t):
    """Mirrors the kernel's math and bf16 rounding points exactly (folded weights)."""
    B, C, H, W = x.shape
    xr = _r_bf16(x.reshape(B, C, H * W))
    w1 = model.w1p_b.astype(jnp.float32)
    w2 = model.w2p_b.astype(jnp.float32)
    t_norm = jnp.asarray(t, jnp.float32) / jnp.float32(model.net.num_timesteps)
    bias1 = (model.b1c + t_norm * model.w_t_col)[None]          # (1, HIDDEN, 1)
    h = jnp.einsum('hc,bcp->bhp', w1, xr) + bias1
    h = _r_bf16(jnp.maximum(h, 0.0))
    out = jnp.einsum('ch,bhp->bcp', w2, h) + model.b2p[None]
    return out.reshape(B, C, H, W)


# ---------------------------------------------------------------------------
if __name__ == "__main__":
    B, C, H, W = 2, 4, 16, 16
    HIDDEN = 32
    T = 100

    key = jax.random.PRNGKey(0)
    k_net, k_h, k_x = jax.random.split(key, 3)

    net = ChannelMLPDenoiser(k_net, C, HIDDEN, T)
    h_func = ChannelOrthogonalHFunc(k_h, C)

    betas = jnp.linspace(1e-4, 2e-2, T, dtype=jnp.float32)
    alphas_cumprod = jnp.cumprod(1.0 - betas)
    timesteps = jnp.arange(0, T, 10, dtype=jnp.int32)

    model = EpsilonNetSVDGM(net, alphas_cumprod, timesteps, h_func)

    x_t = jax.random.normal(k_x, (B, C, H, W), jnp.float32)
    t = 40

    out = jax.block_until_ready(model.forward(x_t, t))
    assert out.shape == (B, C, H, W)

    # Tight check: reference with the same folded weights / bf16 rounding points as
    # the kernel (only f32 accumulation-order differences remain).
    ref_folded = _reference_folded(model, x_t, t)
    assert jnp.allclose(out, ref_folded, atol=2e-3, rtol=2e-3), \
        "Pallas output mismatch vs folded reference"

    # Loose check: the literal module semantics Vt(net(V(x), t)) in plain f32
    # (folding + bf16 operands shift rounding points -> generous tolerance).
    ref_literal = h_func.Vt(net(h_func.V(x_t), t))
    assert jnp.allclose(out, ref_literal, atol=5e-2, rtol=5e-2), \
        "Pallas output mismatch vs literal composition"

    # Second call with a different timestep: hits the jit cache, exercises the
    # SMEM scalar-prefetch timestep path with a new value.
    _ = jax.block_until_ready(model.forward(x_t, 7))

    # Smoke-test the EpsilonNet API glue around the fused forward.
    _ = jax.block_until_ready(model.predict_x0(x_t, t))
    _ = jax.block_until_ready(model.score(x_t, t))

    print("KERNEL_OK")
</pallas_src>

<mosaic_0001>
module attributes {stable_mosaic.version = 11 : i64} {
  func.func @_svdgm_kernel(%arg0: i32, %arg1: memref<1xi32, #tpu.memory_space<smem>>, %arg2: memref<2x4x256xf32, #tpu.memory_space<vmem>>, %arg3: memref<32x4xbf16, #tpu.memory_space<vmem>>, %arg4: memref<32x1xf32, #tpu.memory_space<vmem>>, %arg5: memref<32x1xf32, #tpu.memory_space<vmem>>, %arg6: memref<4x32xbf16, #tpu.memory_space<vmem>>, %arg7: memref<4x1xf32, #tpu.memory_space<vmem>>, %arg8: memref<2x4x256xf32, #tpu.memory_space<vmem>>) attributes {dimension_semantics = [#tpu.dimension_semantics<parallel>], iteration_bounds = array<i64: 1>, scalar_prefetch = 1 : i64, scratch_operands = 0 : i64, tpu.core_type = #tpu.core_type<tc>, window_params = [{transform_indices = @transform_0, window_bounds = array<i64: 2, 4, 256>}, {pipeline_mode = #tpu.pipeline_mode<synchronous>, transform_indices = @transform_1, window_bounds = array<i64: 32, 4>}, {pipeline_mode = #tpu.pipeline_mode<synchronous>, transform_indices = @transform_2, window_bounds = array<i64: 32, 1>}, {pipeline_mode = #tpu.pipeline_mode<synchronous>, transform_indices = @transform_3, window_bounds = array<i64: 32, 1>}, {pipeline_mode = #tpu.pipeline_mode<synchronous>, transform_indices = @transform_4, window_bounds = array<i64: 4, 32>}, {pipeline_mode = #tpu.pipeline_mode<synchronous>, transform_indices = @transform_5, window_bounds = array<i64: 4, 1>}, {transform_indices = @transform_6, window_bounds = array<i64: 2, 4, 256>}]} {
    %c0 = arith.constant 0 : index
    %0 = memref.load %arg1[%c0] : memref<1xi32, #tpu.memory_space<smem>>
    %1 = arith.sitofp %0 : i32 to f32
    %cst = arith.constant 0.00999999977 : f32
    %2 = arith.mulf %1, %cst : f32
    %c0_0 = arith.constant 0 : index
    %c0_1 = arith.constant 0 : index
    %3 = vector.load %arg4[%c0_0, %c0_1] : memref<32x1xf32, #tpu.memory_space<vmem>>, vector<32x1xf32>
    %c0_2 = arith.constant 0 : index
    %c0_3 = arith.constant 0 : index
    %4 = vector.load %arg5[%c0_2, %c0_3] : memref<32x1xf32, #tpu.memory_space<vmem>>, vector<32x1xf32>
    %5 = vector.broadcast %2 : f32 to vector<32x1xf32>
    %6 = arith.mulf %5, %4 : vector<32x1xf32>
    %7 = arith.addf %3, %6 : vector<32x1xf32>
    %c0_4 = arith.constant 0 : index
    %c0_5 = arith.constant 0 : index
    %c0_6 = arith.constant 0 : index
    %8 = vector.load %arg2[%c0_4, %c0_5, %c0_6] : memref<2x4x256xf32, #tpu.memory_space<vmem>>, vector<1x4x256xf32>
    %9 = vector.shape_cast %8 : vector<1x4x256xf32> to vector<4x256xf32>
    %10 = arith.truncf %9 : vector<4x256xf32> to vector<4x256xbf16>
    %c0_7 = arith.constant 0 : index
    %c0_8 = arith.constant 0 : index
    %11 = vector.load %arg3[%c0_7, %c0_8] : memref<32x4xbf16, #tpu.memory_space<vmem>>, vector<32x4xbf16>
    %cst_9 = arith.constant dense<0.000000e+00> : vector<32x256xf32>
    %12 = tpu.matmul %11, %10, %cst_9 {dimension_numbers = #tpu.dot_dimension_numbers<[1], [0], [0], [1], [0, 0, 1, 1], [], []>} : vector<32x4xbf16>, vector<4x256xbf16>, vector<32x256xf32> -> vector<32x256xf32>
    %13 = vector.broadcast %7 : vector<32x1xf32> to vector<32x256xf32>
    %14 = arith.addf %12, %13 : vector<32x256xf32>
    %cst_10 = arith.constant 0.000000e+00 : f32
    %15 = vector.broadcast %cst_10 : f32 to vector<32x256xf32>
    %16 = arith.maximumf %14, %15 : vector<32x256xf32>
    %c0_11 = arith.constant 0 : index
    %c0_12 = arith.constant 0 : index
    %17 = vector.load %arg6[%c0_11, %c0_12] : memref<4x32xbf16, #tpu.memory_space<vmem>>, vector<4x32xbf16>
    %18 = arith.truncf %16 : vector<32x256xf32> to vector<32x256xbf16>
    %cst_13 = arith.constant dense<0.000000e+00> : vector<4x256xf32>
    %19 = tpu.matmul %17, %18, %cst_13 {dimension_numbers = #tpu.dot_dimension_numbers<[1], [0], [0], [1], [0, 0, 1, 1], [], []>} : vector<4x32xbf16>, vector<32x256xbf16>, vector<4x256xf32> -> vector<4x256xf32>
    %c0_14 = arith.constant 0 : index
    %c0_15 = arith.constant 0 : index
    %20 = vector.load %arg7[%c0_14, %c0_15] : memref<4x1xf32, #tpu.memory_space<vmem>>, vector<4x1xf32>
    %21 = vector.broadcast %20 : vector<4x1xf32> to vector<4x256xf32>
    %22 = arith.addf %19, %21 : vector<4x256xf32>
    %c0_16 = arith.constant 0 : index
    %c0_17 = arith.constant 0 : index
    %c0_18 = arith.constant 0 : index
    %23 = vector.load %arg8[%c0_16, %c0_17, %c0_18] : memref<2x4x256xf32, #tpu.memory_space<vmem>>, vector<1x4x256xf32>
    %24 = vector.shape_cast %23 : vector<1x4x256xf32> to vector<4x256xf32>
    %25 = vector.shape_cast %22 : vector<4x256xf32> to vector<1x4x256xf32>
    tpu.vector_store %arg8[%c0_16, %c0_17, %c0_18], %25 {strides = array<i32>} : memref<2x4x256xf32, #tpu.memory_space<vmem>>, vector<1x4x256xf32>,
    %c1 = arith.constant 1 : index
    %c0_19 = arith.constant 0 : index
    %c0_20 = arith.constant 0 : index
    %26 = vector.load %arg2[%c1, %c0_19, %c0_20] : memref<2x4x256xf32, #tpu.memory_space<vmem>>, vector<1x4x256xf32>
    %27 = vector.shape_cast %26 : vector<1x4x256xf32> to vector<4x256xf32>
    %28 = arith.truncf %27 : vector<4x256xf32> to vector<4x256xbf16>
    %c0_21 = arith.constant 0 : index
    %c0_22 = arith.constant 0 : index
    %29 = vector.load %arg3[%c0_21, %c0_22] : memref<32x4xbf16, #tpu.memory_space<vmem>>, vector<32x4xbf16>
    %cst_23 = arith.constant dense<0.000000e+00> : vector<32x256xf32>
    %30 = tpu.matmul %29, %28, %cst_23 {dimension_numbers = #tpu.dot_dimension_numbers<[1], [0], [0], [1], [0, 0, 1, 1], [], []>} : vector<32x4xbf16>, vector<4x256xbf16>, vector<32x256xf32> -> vector<32x256xf32>
    %31 = vector.broadcast %7 : vector<32x1xf32> to vector<32x256xf32>
    %32 = arith.addf %30, %31 : vector<32x256xf32>
    %cst_24 = arith.constant 0.000000e+00 : f32
    %33 = vector.broadcast %cst_24 : f32 to vector<32x256xf32>
    %34 = arith.maximumf %32, %33 : vector<32x256xf32>
    %c0_25 = arith.constant 0 : index
    %c0_26 = arith.constant 0 : index
    %35 = vector.load %arg6[%c0_25, %c0_26] : memref<4x32xbf16, #tpu.memory_space<vmem>>, vector<4x32xbf16>
    %36 = arith.truncf %34 : vector<32x256xf32> to vector<32x256xbf16>
    %cst_27 = arith.constant dense<0.000000e+00> : vector<4x256xf32>
    %37 = tpu.matmul %35, %36, %cst_27 {dimension_numbers = #tpu.dot_dimension_numbers<[1], [0], [0], [1], [0, 0, 1, 1], [], []>} : vector<4x32xbf16>, vector<32x256xbf16>, vector<4x256xf32> -> vector<4x256xf32>
    %c0_28 = arith.constant 0 : index
    %c0_29 = arith.constant 0 : index
    %38 = vector.load %arg7[%c0_28, %c0_29] : memref<4x1xf32, #tpu.memory_space<vmem>>, vector<4x1xf32>
    %39 = vector.broadcast %38 : vector<4x1xf32> to vector<4x256xf32>
    %40 = arith.addf %37, %39 : vector<4x256xf32>
    %c1_30 = arith.constant 1 : index
    %c0_31 = arith.constant 0 : index
    %c0_32 = arith.constant 0 : index
    %41 = vector.load %arg8[%c1_30, %c0_31, %c0_32] : memref<2x4x256xf32, #tpu.memory_space<vmem>>, vector<1x4x256xf32>
    %42 = vector.shape_cast %41 : vector<1x4x256xf32> to vector<4x256xf32>
    %43 = vector.shape_cast %40 : vector<4x256xf32> to vector<1x4x256xf32>
    tpu.vector_store %arg8[%c1_30, %c0_31, %c0_32], %43 {strides = array<i32>} : memref<2x4x256xf32, #tpu.memory_space<vmem>>, vector<1x4x256xf32>,
    return
  }
  func.func @transform_0(%arg0: i32, %arg1: memref<1xi32, #tpu.memory_space<smem>>) -> (i32, i32, i32) {
    %c0_i32 = arith.constant 0 : i32
    %c0_i32_0 = arith.constant 0 : i32
    %c0_i32_1 = arith.constant 0 : i32
    return %c0_i32, %c0_i32_0, %arg0 : i32, i32, i32
  }
  func.func @transform_1(%arg0: i32, %arg1: memref<1xi32, #tpu.memory_space<smem>>) -> (i32, i32) {
    %c0_i32 = arith.constant 0 : i32
    %c0_i32_0 = arith.constant 0 : i32
    %c0_i32_1 = arith.constant 0 : i32
    return %c0_i32, %c0_i32_0 : i32, i32
  }
  func.func @transform_2(%arg0: i32, %arg1: memref<1xi32, #tpu.memory_space<smem>>) -> (i32, i32) {
    %c0_i32 = arith.constant 0 : i32
    %c0_i32_0 = arith.constant 0 : i32
    %c0_i32_1 = arith.constant 0 : i32
    return %c0_i32, %c0_i32_0 : i32, i32
  }
  func.func @transform_3(%arg0: i32, %arg1: memref<1xi32, #tpu.memory_space<smem>>) -> (i32, i32) {
    %c0_i32 = arith.constant 0 : i32
    %c0_i32_0 = arith.constant 0 : i32
    %c0_i32_1 = arith.constant 0 : i32
    return %c0_i32, %c0_i32_0 : i32, i32
  }
  func.func @transform_4(%arg0: i32, %arg1: memref<1xi32, #tpu.memory_space<smem>>) -> (i32, i32) {
    %c0_i32 = arith.constant 0 : i32
    %c0_i32_0 = arith.constant 0 : i32
    %c0_i32_1 = arith.constant 0 : i32
    return %c0_i32, %c0_i32_0 : i32, i32
  }
  func.func @transform_5(%arg0: i32, %arg1: memref<1xi32, #tpu.memory_space<smem>>) -> (i32, i32) {
    %c0_i32 = arith.constant 0 : i32
    %c0_i32_0 = arith.constant 0 : i32
    %c0_i32_1 = arith.constant 0 : i32
    return %c0_i32, %c0_i32_0 : i32, i32
  }
  func.func @transform_6(%arg0: i32, %arg1: memref<1xi32, #tpu.memory_space<smem>>) -> (i32, i32, i32) {
    %c0_i32 = arith.constant 0 : i32
    %c0_i32_0 = arith.constant 0 : i32
    %c0_i32_1 = arith.constant 0 : i32
    return %c0_i32, %c0_i32_0, %arg0 : i32, i32, i32
  }
}

</mosaic_0001>

<bundles_post_ra>
// kernel: _fused_svdgm_forward.1
= control target key start
LH: loop header
LB: loop body
LE: loop exit
PB: predicated region body
PF: predicated region fallthrough
CT: control target
= control target key end

     0   :  { %vm93_vm0 = vcmask 1041408   ;;  %v404_v1 = vmov 0   ;;  %vm86_vm1 = vcmask 31744   ;;  %vm172_vm2 = vcmask 261120   ;;  %s550_s1 = inlined_call_operand.vmem [shape: f32[2,4,256], index: 1, kind: input, shape index: {}]   ;;  %s551_s2 = inlined_call_operand.vmem [shape: bf16[32,4], index: 2, kind: input, shape index: {}]   ;;  %s552_s0 = inlined_call_operand.<no memory space> [shape: s32[1], index: 0, kind: input, shape index: {}]   ;;  %s553_s4 = inlined_call_operand.vmem [shape: f32[32,1], index: 4, kind: input, shape index: {}]   ;;  %s554_s3 = inlined_call_operand.vmem [shape: f32[32,1], index: 3, kind: input, shape index: {}]   ;;  %s555_s6 = inlined_call_operand.vmem [shape: f32[4,1], index: 6, kind: input, shape index: {}]   ;;  %s556_s5 = inlined_call_operand.vmem [shape: bf16[4,32], index: 5, kind: input, shape index: {}]   ;;  %s557_s7 = inlined_call_operand.vmem [shape: f32[2,4,256], index: 7, kind: output, shape index: {}]  }
   0x1   :  { %v46_v0 = vld [vmem:[%s550_s1] sm:$0xff]  ;;  %132 = vmatprep.mubr.bf16.mxu0 %v404_v1  ;;  %397 = vset.pattern.permute.xlu1 %v404_v1  ;;  %s27_s28 = scvt.s32.f32 %s552_s0  ;;  %v35_v7 = vld [vmem:[%s553_s4 + $0x10] sm:$0xff]  ;;  %v34_v11 = vld [vmem:[%s553_s4 + $0x8] sm:$0xff] }
   0x2   :  { %v48_v2 = vcombine.high %v46_v0, %v46_v0  ;;  %v50_v3 = vpack.c.bf16 %v46_v0, %v46_v0  ;;  %396 = vset.pattern.permute.xlu0 %v404_v1  ;;  %208 = vmatprep.mubr.bf16.mxu1 %v404_v1  ;;  %v33_v6 = vld [vmem:[%s553_s4] sm:$0xff]  ;;  %v31_v10 = vld [vmem:[%s554_s3 + $0x10] sm:$0xff]  ;;  %v30_v15 = vld [vmem:[%s554_s3 + $0x8] sm:$0xff] }
   0x3   :  { %s28_s29 = smul.f32 0.01, %s27_s28  ;;  %v29_v8 = vld [vmem:[%s554_s3] sm:$0xff]  ;;  %v36_v17 = vld [vmem:[%s553_s4 + $0x18] sm:$0xff]  ;;  %v401_v24 = vld [vmem:[%s551_s2 + $0x8] sm:$0xff]  }
   0x4   :  { %v51_v4 = vpack.c.bf16 %v48_v2, %v48_v2  ;;  %v95_v5 = vsel %vm93_vm0, %v50_v3, 0  ;;  %v400_v12 = vld [vmem:[%s551_s2] sm:$0xff]   ;;  %v32_v21 = vld [vmem:[%s554_s3 + $0x18] sm:$0xff]  ;;  %v387_v45 = vld [vmem:[%s550_s1 + $0x8] sm:$0xff] }
   0x5   :  { %v37_v9 = vstv %s28_s29  ;;  %v321_v25 = vld [vmem:[%s555_s6] sm:$0xf]  ;;  %v225_v53 = vcombine.high %v387_v45, %v387_v45  ;;  %v227_v61 = vpack.c.bf16 %v387_v45, %v387_v45  ;;  %v403_v3 = vld [vmem:[%s551_s2 + $0x8] sm:$0xff]  }
   0x6   :  { %383 = vmatprep.subr.msk.bf16.mxu0 %vm93_vm0, %v51_v4  ;;  %v38_v13 = vmul.f32 %v37_v9, %v33_v6  ;;  %v40_v14 = vmul.f32 %v37_v9, %v35_v7  ;;  %v39_v16 = vmul.f32 %v37_v9, %v34_v11  ;;  %v41_v18 = vmul.f32 %v37_v9, %v36_v17  ;;  %v166_v26 = vld [vmem:[%s555_s6] sm:$0xf] }
   0x7   :  { %115 = vmatpush1.bf16.msra.mxu0 %v95_v5  ;;  %v228_v60 = vpack.c.bf16 %v225_v53, %v225_v53  ;;  %v161_v63 = vld [vmem:[%s556_s5] sm:$0x3]  ;;  %v250_v0 = vsel %vm93_vm0, %v227_v61, 0 }
   0x8   :  { %v42_v19 = vadd.f32 %v38_v13, %v29_v8  ;;  %v44_v20 = vadd.f32 %v40_v14, %v31_v10  ;;  %v43_v22 = vadd.f32 %v39_v16, %v30_v15  ;;  %v45_v23 = vadd.f32 %v41_v18, %v32_v21  ;;  %v402_v2 = vld [vmem:[%s551_s2] sm:$0xff]  }
   0xa   :  { %384 = vmatmul.mubr.msk.bf16.vlgmr.msra.gmra.mxu0 %vm86_vm1, %v400_v12  ;;  %58 = vperm.xlu1 %397, %v42_v19  }
   0xb   :  { %142 = vmatprep.mubr.bf16.mxu0 %v404_v1  ;;  %68 = vperm.xlu0 %396, %v44_v20  }
   0xe   :  { %63 = vperm.xlu1 %397, %v43_v22  }
   0xf   :  { %73 = vperm.xlu0 %396, %v45_v23  }
  0x12   :  { %385 = vmatmul.mubr.msk.bf16.gmra.mxu0 %vm86_vm1, %v401_v24  ;;  %324 = vperm.xlu1 %397, %v321_v25  }
  0x13   :  { %169 = vperm.xlu0 %396, %v166_v26   ;;  %362 = vmatprep.mubr.bf16.mxu0 %v404_v1 }
  0x85   :  { %v497_v30 = vpop.permute.xlu1 %58 }
  0x86   :  { %v499_v31 = vpop.permute.xlu0 %68 }
  0x89   :  { %v501_v35 = vpop.permute.xlu1 %63 }
  0x8a   :  { %v503_v36 = vpop.permute.xlu0 %73 }
  0x8e   :  { %v170_v5 = vpop.permute.xlu0 %169 }
  0xca   :  { %v134_v27 = vpop.f32.mrf.mxu0 }
  0xcb   :  { %v135_v51 = vadd.f32 %v134_v27, %v497_v30 }
  0xcc   :  { %v136_v28 = vpop.f32.mrf.mxu0 }
  0xcd   :  { %v137_v43 = vadd.f32 %v136_v28, %v497_v30  ;;  %v153_v59 = vmax.f32 %v135_v51, 0.0 }
  0xce   :  { %v138_v29 = vpop.f32.mrf.mxu0 }
  0xcf   :  { %v139_v46 = vadd.f32 %v138_v29, %v501_v35  ;;  %v154_v54 = vmax.f32 %v137_v43, 0.0 }
  0xd0   :  { %v140_v32 = vpop.f32.mrf.mxu0 }
  0xd1   :  { %v141_v38 = vadd.f32 %v140_v32, %v501_v35  ;;  %v155_v57 = vmax.f32 %v139_v46, 0.0 }
  0xd2   :  { %v144_v33 = vpop.f32.mrf.mxu0 }
  0xd3   :  { %v145_v41 = vadd.f32 %v144_v33, %v499_v31  ;;  %v156_v48 = vmax.f32 %v141_v38, 0.0  ;;  %v162_v62 = vpack.c.bf16 %v155_v57, %v153_v59 }
  0xd4   :  { %v146_v34 = vpop.f32.mrf.mxu0 }
  0xd5   :  { %v147_v39 = vadd.f32 %v146_v34, %v499_v31  ;;  %v157_v52 = vmax.f32 %v145_v41, 0.0  ;;  %v163_v58 = vpack.c.bf16 %v156_v48, %v154_v54 }
  0xd6   :  { %v148_v37 = vpop.f32.mrf.mxu0 }
  0xd7   :  { %v149_v40 = vadd.f32 %v148_v37, %v503_v36  ;;  %v158_v49 = vmax.f32 %v147_v39, 0.0 }
  0xd8   :  { %v150_v42 = vpop.f32.mrf.mxu0 }
  0xd9   :  { %v151_v44 = vadd.f32 %v150_v42, %v503_v36  ;;  %v159_v47 = vmax.f32 %v149_v40, 0.0 }
  0xdb   :  { %v160_v50 = vmax.f32 %v151_v44, 0.0  ;;  %v164_v56 = vpack.c.bf16 %v159_v47, %v157_v52 }
  0xdd   :  { %v165_v55 = vpack.c.bf16 %v160_v50, %v158_v49 }
  0xdf   :  { %188 = vmatprep.subr.bf16.mxu1 %v165_v55 }
  0xe0   :  { %189 = vmatpush1.bf16.msra.mxu1 %v164_v56 }
  0xe1   :  { %190 = vmatprep.subr.bf16.mxu1 %v163_v58 }
  0xe4   :  { %191 = vmatpush1.bf16.msra.mxu1 %v162_v62 }
  0xe5   :  { %390 = vmatprep.subr.msk.bf16.mxu1 %vm93_vm0, %v228_v60 }
  0xe7   :  { %386 = vmatmul.mubr.msk.bf16.vlgmr.msra.gmra.mxu1 %vm172_vm2, %v161_v63 }
  0xe8   :  { %270 = vmatpush1.bf16.msra.mxu1 %v250_v0  ;;  %287 = vmatprep.mubr.bf16.mxu1 %v404_v1 }
  0xef   :  { %391 = vmatmul.mubr.msk.bf16.vlgmr.msra.gmra.mxu1 %vm86_vm1, %v402_v2 }
  0xf0   :  { %297 = vmatprep.mubr.bf16.mxu1 %v404_v1 }
  0xf7   :  { %392 = vmatmul.mubr.msk.bf16.gmra.mxu1 %vm86_vm1, %v403_v3 }
 0x1a7   :  { %v210_v4 = vpop.f32.mrf.mxu1 }
 0x1a8   :  { %v211_v7 = vadd.f32 %v210_v4, %v170_v5 }
 0x1a9   :  { %v212_v6 = vpop.f32.mrf.mxu1 }
 0x1aa   :  { %v213_v8 = vadd.f32 %v212_v6, %v170_v5 }
 0x1ab   :  { %v214_v9 = vpop.f32.mrf.mxu1 }
 0x1ac   :  { %v219_v10 = vcombine.low %v211_v7, %v213_v8 }
 0x1ad   :  { %v215_v11 = vpop.f32.mrf.mxu1 }
 0x1ae   :  { %221 = vst [vmem:[%s557_s7] sm:$0xff] %v219_v10 }
 0x1af   :  { %v289_v12 = vpop.f32.mrf.mxu1 }
 0x1b0   :  { %v290_v32 = vadd.f32 %v289_v12, %v497_v30 }
 0x1b1   :  { %v291_v1 = vpop.f32.mrf.mxu1 }
 0x1b2   :  { %v292_v23 = vadd.f32 %v291_v1, %v497_v30  ;;  %v325_v30 = vpop.permute.xlu1 %324 }
 0x1b3   :  { %v293_v13 = vpop.f32.mrf.mxu1 }
 0x1b4   :  { %v294_v25 = vadd.f32 %v293_v13, %v501_v35  ;;  %v309_v34 = vmax.f32 %v292_v23, 0.0 }
 0x1b5   :  { %v295_v14 = vpop.f32.mrf.mxu1 }
 0x1b6   :  { %v296_v18 = vadd.f32 %v295_v14, %v501_v35  ;;  %v310_v38 = vmax.f32 %v294_v25, 0.0  ;;  %v316_v35 = vld [vmem:[%s556_s5] sm:$0x3] }
 0x1b7   :  { %v299_v15 = vpop.f32.mrf.mxu1 }
 0x1b8   :  { %v300_v21 = vadd.f32 %v299_v15, %v499_v31  ;;  %v311_v27 = vmax.f32 %v296_v18, 0.0 }
 0x1b9   :  { %v301_v16 = vpop.f32.mrf.mxu1 }
 0x1ba   :  { %v302_v19 = vadd.f32 %v301_v16, %v499_v31  ;;  %v312_v33 = vmax.f32 %v300_v21, 0.0  ;;  %v318_v40 = vpack.c.bf16 %v311_v27, %v309_v34  ;;  %v308_v31 = vmax.f32 %v290_v32, 0.0 }
 0x1bb   :  { %v303_v17 = vpop.f32.mrf.mxu1 }
 0x1bc   :  { %v304_v20 = vadd.f32 %v303_v17, %v503_v36  ;;  %v313_v28 = vmax.f32 %v302_v19, 0.0  ;;  %v317_v41 = vpack.c.bf16 %v310_v38, %v308_v31 }
 0x1bd   :  { %v305_v22 = vpop.f32.mrf.mxu1 }
 0x1be   :  { %v306_v24 = vadd.f32 %v305_v22, %v503_v36  ;;  %v314_v26 = vmax.f32 %v304_v20, 0.0 }
 0x1c0   :  { %v315_v29 = vmax.f32 %v306_v24, 0.0  ;;  %v319_v39 = vpack.c.bf16 %v314_v26, %v312_v33 }
 0x1c2   :  { %v320_v37 = vpack.c.bf16 %v315_v29, %v313_v28 }
 0x1c4   :  { %342 = vmatprep.subr.bf16.mxu0 %v320_v37 }
 0x1c5   :  { %343 = vmatpush1.bf16.msra.mxu0 %v319_v39 }
 0x1c6   :  { %344 = vmatprep.subr.bf16.mxu0 %v318_v40 }
 0x1c9   :  { %345 = vmatpush1.bf16.msra.mxu0 %v317_v41 }
 0x1cc   :  { %393 = vmatmul.mubr.msk.bf16.vlgmr.msra.gmra.mxu0 %vm172_vm2, %v316_v35 }
 0x28c   :  { %v364_v36 = vpop.f32.mrf.mxu0 }
 0x28d   :  { %v365_v43 = vadd.f32 %v364_v36, %v325_v30 }
 0x28e   :  { %v366_v42 = vpop.f32.mrf.mxu0 }
 0x28f   :  { %v367_v44 = vadd.f32 %v366_v42, %v325_v30 }
 0x290   :  { %v368_v45 = vpop.f32.mrf.mxu0 }
 0x291   :  { %v373_v46 = vcombine.low %v365_v43, %v367_v44 }
 0x292   :  { %v369_v47 = vpop.f32.mrf.mxu0 }
 0x293   :  { %394 = vst [vmem:[%s557_s7 + $0x8] sm:$0xff] %v373_v46 }

</bundles_post_ra>
